<compile_context>
chip_gen: v7x
topology: tpu7x:2x2x1
jax: 0.10.0
libtpu: 0.0.40
codegen_flags: <defaults>
</compile_context>

<pallas_src>
import functools

import jax
import jax.numpy as jnp
from jax.experimental import pallas as pl
from jax.experimental.pallas import tpu as pltpu


def _round_up(x, m):
    return (x + m - 1) // m * m


def _cdiv(a, b):
    return (a + b - 1) // b


def _tdnn_matmul_stats_kernel(xu_ref, w_ref, bias_ref,        # inputs
                              h_ref, sum_ref, ssq_ref,        # outputs
                              *, t_tile, t_valid):
    t = pl.program_id(2)

    # Single MXU matmul per (batch, o-block, t-tile): bf16 operands, f32 acc.
    acc = jnp.dot(xu_ref[0], w_ref[...],
                  preferred_element_type=jnp.float32)         # (t_tile, o_tile)
    acc = jnp.maximum(acc + bias_ref[...], 0.0)               # bias + ReLU

    h_ref[...] = acc[None].astype(h_ref.dtype)                # bf16 store

    # Masked per-channel partial stats (rows at/after T_new are T padding).
    row = jax.lax.broadcasted_iota(jnp.int32, (t_tile, 1), 0) + t * t_tile
    hv = jnp.where(row < t_valid, acc, 0.0)
    psum = jnp.sum(hv, axis=0, keepdims=True)                 # (1, o_tile)
    pssq = jnp.sum(hv * hv, axis=0, keepdims=True)            # (1, o_tile)

    @pl.when(t == 0)
    def _():
        sum_ref[...] = psum[None]
        ssq_ref[...] = pssq[None]

    @pl.when(t != 0)
    def _():
        sum_ref[...] += psum[None]
        ssq_ref[...] += pssq[None]


def _bn_affine_kernel(h_ref, scale_ref, shift_ref, o_ref):
    h = h_ref[...].astype(jnp.float32)
    o_ref[...] = (h * scale_ref[...] + shift_ref[...]).astype(o_ref.dtype)


def tdnn_forward(x, weight, bias, gamma, beta, *, context_size, dilation,
                 eps=1e-5, t_tile=512, o_tile=256):
    """x: (B, T, D) f32; weight: (O, context_size*D); bias/gamma/beta: (O,)."""
    B, T, D = x.shape
    O = weight.shape[0]
    halo = dilation * (context_size - 1)
    T_new = T - halo
    assert T_new > 0, "sequence too short for this context/dilation"

    f32, bf16 = jnp.float32, jnp.bfloat16

    K = context_size * D
    K_pad = _round_up(K, 128)                                  # lane-dense LHS K

    # Output-channel blocking: o_tile is a multiple of 128 dividing O_pad; it
    # adds a second "parallel" grid axis so both v7x TensorCores get work even
    # when B is 1 or odd.
    o_tile = _round_up(max(128, min(o_tile, _round_up(O, 128))), 128)
    O_pad = _round_up(O, o_tile)
    num_o = O_pad // o_tile

    # Time blocking (multiple of 8 sublanes).
    t_tile = _round_up(max(8, min(t_tile, _round_up(T_new, 8))), 8)
    num_t = _cdiv(T_new, t_tile)
    T_out_pad = num_t * t_tile

    # -------- host-side unfold: lane-dense (B, T_pad, K_pad) bf16 slab -------
    # (frames-major, feats-minor — same ordering as F.unfold in the module)
    cols = [x[:, c * dilation:c * dilation + T_new, :]
            for c in range(context_size)]
    x_unf = jnp.concatenate(cols, axis=-1).astype(bf16)        # (B, T_new, K)
    x_unf_p = jnp.zeros((B, T_out_pad, K_pad), bf16).at[:, :T_new, :K].set(x_unf)

    w_p = jnp.zeros((K_pad, O_pad), bf16).at[:K, :O].set(
        jnp.asarray(weight, f32).T.astype(bf16))
    bias_p = jnp.zeros((1, O_pad), f32).at[:, :O].set(jnp.asarray(bias, f32))
    gamma_p = jnp.zeros((1, O_pad), f32).at[:, :O].set(jnp.asarray(gamma, f32))
    beta_p = jnp.zeros((1, O_pad), f32).at[:, :O].set(jnp.asarray(beta, f32))

    kernel1 = functools.partial(_tdnn_matmul_stats_kernel,
                                t_tile=t_tile, t_valid=T_new)

    # -------- pass 1: matmul + bias + ReLU, plus per-batch sum / sumsq -------
    h, psum, pssq = pl.pallas_call(
        kernel1,
        out_shape=(
            jax.ShapeDtypeStruct((B, T_out_pad, O_pad), bf16),   # h in bf16
            jax.ShapeDtypeStruct((B, 1, O_pad), f32),
            jax.ShapeDtypeStruct((B, 1, O_pad), f32),
        ),
        grid_spec=pltpu.PrefetchScalarGridSpec(
            num_scalar_prefetch=0,
            grid=(B, num_o, num_t),
            in_specs=[
                pl.BlockSpec((1, t_tile, K_pad), lambda b, o, t: (b, t, 0)),
                pl.BlockSpec((K_pad, o_tile), lambda b, o, t: (0, o)),
                pl.BlockSpec((1, o_tile), lambda b, o, t: (0, o)),
            ],
            out_specs=[
                pl.BlockSpec((1, t_tile, o_tile), lambda b, o, t: (b, t, o)),
                pl.BlockSpec((1, 1, o_tile), lambda b, o, t: (b, 0, o)),
                pl.BlockSpec((1, 1, o_tile), lambda b, o, t: (b, 0, o)),
            ],
        ),
        compiler_params=pltpu.CompilerParams(
            dimension_semantics=("parallel", "parallel", "arbitrary"),
            vmem_limit_bytes=64 * 1024 * 1024),
    )(x_unf_p, w_p, bias_p)

    # -------- training-mode BatchNorm1d stats (biased var) -> scale/shift ----
    count = float(B * T_new)
    s = jnp.sum(psum, axis=0)                                   # (1, O_pad)
    ss = jnp.sum(pssq, axis=0)                                  # (1, O_pad)
    mean = s / count
    var = jnp.maximum(ss / count - mean * mean, 0.0)
    scale = gamma_p * jax.lax.rsqrt(var + eps)
    shift = beta_p - mean * scale

    # -------- pass 2: per-channel affine (the normalize step) ----------------
    out = pl.pallas_call(
        _bn_affine_kernel,
        out_shape=jax.ShapeDtypeStruct((B, T_out_pad, O_pad), f32),
        grid_spec=pltpu.PrefetchScalarGridSpec(
            num_scalar_prefetch=0,
            grid=(B, num_t),
            in_specs=[
                pl.BlockSpec((1, t_tile, O_pad), lambda b, t: (b, t, 0)),
                pl.BlockSpec((1, O_pad), lambda b, t: (0, 0)),
                pl.BlockSpec((1, O_pad), lambda b, t: (0, 0)),
            ],
            out_specs=pl.BlockSpec((1, t_tile, O_pad), lambda b, t: (b, t, 0)),
        ),
        compiler_params=pltpu.CompilerParams(
            dimension_semantics=("parallel", "parallel"),
            vmem_limit_bytes=64 * 1024 * 1024),
    )(h, scale, shift)

    # For production O (multiple of 128) this only trims padded T rows.
    return out[:, :T_new, :O]


def tdnn_ref(x, weight, bias, gamma, beta, context_size, dilation, eps=1e-5):
    """Pure-JAX f32 reference mirroring F.unfold ordering."""
    B, T, D = x.shape
    T_new = T - dilation * (context_size - 1)
    cols = [x[:, c * dilation:c * dilation + T_new, :] for c in range(context_size)]
    x_unf = jnp.concatenate(cols, axis=-1)                      # (B, T_new, C*D)
    h = jnp.maximum(x_unf @ weight.T + bias, 0.0)
    mean = h.mean(axis=(0, 1), keepdims=True)
    var = ((h - mean) ** 2).mean(axis=(0, 1), keepdims=True)
    return (h - mean) / jnp.sqrt(var + eps) * gamma + beta


def tdnn_ref_matched(x, weight, bias, gamma, beta, context_size, dilation,
                     eps=1e-5):
    """Reference reproducing the kernel's quantization: bf16 x/w operands,
    f32 matmul accumulation + stats, bf16 h storage, f32 affine."""
    xq = x.astype(jnp.bfloat16).astype(jnp.float32)
    wq = weight.astype(jnp.bfloat16).astype(jnp.float32)
    B, T, D = x.shape
    T_new = T - dilation * (context_size - 1)
    cols = [xq[:, c * dilation:c * dilation + T_new, :]
            for c in range(context_size)]
    x_unf = jnp.concatenate(cols, axis=-1)
    h = jnp.maximum(x_unf @ wq.T + bias, 0.0)                   # f32 acc
    mean = h.mean(axis=(0, 1), keepdims=True)                   # stats on f32 h
    var = ((h - mean) ** 2).mean(axis=(0, 1), keepdims=True)
    scale = gamma / jnp.sqrt(var + eps)
    shift = beta - mean * scale
    hq = h.astype(jnp.bfloat16).astype(jnp.float32)             # bf16 h store
    return hq * scale + shift


if __name__ == "__main__":
    # TDNN(input_dim=8, output_dim=32, context_size=3, dilation=1,
    #      batch_norm=True, dropout_p=0.0); input (batch, seq_len, input_dim).
    B, T, D = 2, 16, 8
    O, CTX, DIL = 32, 3, 1

    key = jax.random.PRNGKey(0)
    kx, kw, kb, kg, kbe = jax.random.split(key, 5)
    x = jax.random.normal(kx, (B, T, D), dtype=jnp.float32)
    weight = 0.1 * jax.random.normal(kw, (O, CTX * D), dtype=jnp.float32)
    bias = 0.1 * jax.random.normal(kb, (O,), dtype=jnp.float32)
    gamma = 1.0 + 0.1 * jax.random.normal(kg, (O,), dtype=jnp.float32)
    beta = 0.1 * jax.random.normal(kbe, (O,), dtype=jnp.float32)

    # t_tile=8 exercises multi-tile time blocking + the stats accumulation
    # across the "arbitrary" grid axis.
    out = tdnn_forward(x, weight, bias, gamma, beta,
                       context_size=CTX, dilation=DIL, t_tile=8)
    out = jax.block_until_ready(out)

    T_new = T - DIL * (CTX - 1)
    assert out.shape == (B, T_new, O), out.shape

    # Tight check vs a reference that applies exactly the kernel's quantization
    # (bf16 x/w operands, f32 accumulation, bf16 h storage).
    ref_m = tdnn_ref_matched(x, weight, bias, gamma, beta, CTX, DIL)
    assert jnp.allclose(out, ref_m, atol=1e-3, rtol=1e-3), \
        float(jnp.max(jnp.abs(out - ref_m)))

    # Looser sanity check vs the full-f32 reference (bf16 rounding only).
    ref = tdnn_ref(x, weight, bias, gamma, beta, CTX, DIL)
    assert jnp.allclose(out, ref, atol=1e-1, rtol=1e-1), \
        float(jnp.max(jnp.abs(out - ref)))

    print("KERNEL_OK")
</pallas_src>

<mosaic_0001>
module attributes {stable_mosaic.version = 11 : i64} {
  func.func @_tdnn_matmul_stats_kernel(%arg0: i32, %arg1: i32, %arg2: i32, %arg3: memref<1x8x128xbf16, #tpu.memory_space<vmem>>, %arg4: memref<128x128xbf16, #tpu.memory_space<vmem>>, %arg5: memref<1x128xf32, #tpu.memory_space<vmem>>, %arg6: memref<1x8x128xbf16, #tpu.memory_space<vmem>>, %arg7: memref<1x1x128xf32, #tpu.memory_space<vmem>>, %arg8: memref<1x1x128xf32, #tpu.memory_space<vmem>>) attributes {dimension_semantics = [#tpu.dimension_semantics<parallel>, #tpu.dimension_semantics<parallel>, #tpu.dimension_semantics<arbitrary>], iteration_bounds = array<i64: 2, 1, 2>, scalar_prefetch = 0 : i64, scratch_operands = 0 : i64, tpu.core_type = #tpu.core_type<tc>, window_params = [{transform_indices = @transform_0, window_bounds = array<i64: 1, 8, 128>}, {transform_indices = @transform_1, window_bounds = array<i64: 128, 128>}, {transform_indices = @transform_2, window_bounds = array<i64: 1, 128>}, {transform_indices = @transform_3, window_bounds = array<i64: 1, 8, 128>}, {transform_indices = @transform_4, window_bounds = array<i64: 1, 1, 128>}, {transform_indices = @transform_5, window_bounds = array<i64: 1, 1, 128>}]} {
    %c0 = arith.constant 0 : index
    %c0_0 = arith.constant 0 : index
    %c0_1 = arith.constant 0 : index
    %0 = vector.load %arg3[%c0, %c0_0, %c0_1] : memref<1x8x128xbf16, #tpu.memory_space<vmem>>, vector<1x8x128xbf16>
    %1 = vector.shape_cast %0 : vector<1x8x128xbf16> to vector<8x128xbf16>
    %c0_2 = arith.constant 0 : index
    %c0_3 = arith.constant 0 : index
    %2 = vector.load %arg4[%c0_2, %c0_3] : memref<128x128xbf16, #tpu.memory_space<vmem>>, vector<128x128xbf16>
    %cst = arith.constant dense<0.000000e+00> : vector<8x128xf32>
    %3 = tpu.matmul %1, %2, %cst {dimension_numbers = #tpu.dot_dimension_numbers<[1], [0], [0], [1], [0, 0, 1, 1], [], []>} : vector<8x128xbf16>, vector<128x128xbf16>, vector<8x128xf32> -> vector<8x128xf32>
    %c0_4 = arith.constant 0 : index
    %c0_5 = arith.constant 0 : index
    %4 = vector.load %arg5[%c0_4, %c0_5] : memref<1x128xf32, #tpu.memory_space<vmem>>, vector<1x128xf32>
    %5 = vector.broadcast %4 : vector<1x128xf32> to vector<8x128xf32>
    %6 = arith.addf %3, %5 : vector<8x128xf32>
    %cst_6 = arith.constant 0.000000e+00 : f32
    %7 = vector.broadcast %cst_6 : f32 to vector<8x128xf32>
    %8 = arith.maximumf %6, %7 : vector<8x128xf32>
    %9 = vector.shape_cast %8 : vector<8x128xf32> to vector<1x8x128xf32>
    %10 = arith.truncf %9 : vector<1x8x128xf32> to vector<1x8x128xbf16>
    %c0_7 = arith.constant 0 : index
    %c0_8 = arith.constant 0 : index
    %c0_9 = arith.constant 0 : index
    %11 = vector.load %arg6[%c0_7, %c0_8, %c0_9] : memref<1x8x128xbf16, #tpu.memory_space<vmem>>, vector<1x8x128xbf16>
    tpu.vector_store %arg6[%c0_7, %c0_8, %c0_9], %10 {strides = array<i32>} : memref<1x8x128xbf16, #tpu.memory_space<vmem>>, vector<1x8x128xbf16>,
    %12 = tpu.iota {dimensions = array<i32: 0>} : vector<8x1xi32>
    %c8_i32 = arith.constant 8 : i32
    %13 = arith.muli %arg2, %c8_i32 : i32
    %14 = vector.broadcast %13 : i32 to vector<8x1xi32>
    %15 = arith.addi %12, %14 : vector<8x1xi32>
    %c14_i32 = arith.constant 14 : i32
    %16 = vector.broadcast %c14_i32 : i32 to vector<8x1xi32>
    %17 = arith.cmpi slt, %15, %16 : vector<8x1xi32>
    %cst_10 = arith.constant 0.000000e+00 : f32
    %18 = vector.shape_cast %17 : vector<8x1xi1> to vector<8x1xi1>
    %19 = vector.broadcast %18 : vector<8x1xi1> to vector<8x128xi1>
    %20 = vector.broadcast %cst_10 : f32 to vector<8x128xf32>
    %21 = arith.select %19, %8, %20 : vector<8x128xi1>, vector<8x128xf32>
    %cst_11 = arith.constant dense<0.000000e+00> : vector<128xf32>
    %22 = vector.multi_reduction <add>, %21, %cst_11 [0] : vector<8x128xf32> to vector<128xf32>
    %23 = vector.shape_cast %22 : vector<128xf32> to vector<1x128xf32>
    %24 = arith.mulf %21, %21 : vector<8x128xf32>
    %cst_12 = arith.constant dense<0.000000e+00> : vector<128xf32>
    %25 = vector.multi_reduction <add>, %24, %cst_12 [0] : vector<8x128xf32> to vector<128xf32>
    %26 = vector.shape_cast %25 : vector<128xf32> to vector<1x128xf32>
    %c0_i32 = arith.constant 0 : i32
    %27 = arith.cmpi eq, %arg2, %c0_i32 : i32
    %28 = arith.extui %27 : i1 to i32
    %c0_i32_13 = arith.constant 0 : i32
    %29 = arith.cmpi ne, %28, %c0_i32_13 : i32
    scf.if %29 {
      %33 = vector.shape_cast %23 : vector<1x128xf32> to vector<1x1x128xf32>
      %c0_16 = arith.constant 0 : index
      %c0_17 = arith.constant 0 : index
      %c0_18 = arith.constant 0 : index
      %34 = vector.load %arg7[%c0_16, %c0_17, %c0_18] : memref<1x1x128xf32, #tpu.memory_space<vmem>>, vector<1x1x128xf32>
      tpu.vector_store %arg7[%c0_16, %c0_17, %c0_18], %33 {strides = array<i32>} : memref<1x1x128xf32, #tpu.memory_space<vmem>>, vector<1x1x128xf32>,
      %35 = vector.shape_cast %26 : vector<1x128xf32> to vector<1x1x128xf32>
      %c0_19 = arith.constant 0 : index
      %c0_20 = arith.constant 0 : index
      %c0_21 = arith.constant 0 : index
      %36 = vector.load %arg8[%c0_19, %c0_20, %c0_21] : memref<1x1x128xf32, #tpu.memory_space<vmem>>, vector<1x1x128xf32>
      tpu.vector_store %arg8[%c0_19, %c0_20, %c0_21], %35 {strides = array<i32>} : memref<1x1x128xf32, #tpu.memory_space<vmem>>, vector<1x1x128xf32>,
    } else {
    }
    %c0_i32_14 = arith.constant 0 : i32
    %30 = arith.cmpi ne, %arg2, %c0_i32_14 : i32
    %31 = arith.extui %30 : i1 to i32
    %c0_i32_15 = arith.constant 0 : i32
    %32 = arith.cmpi ne, %31, %c0_i32_15 : i32
    scf.if %32 {
      %c0_16 = arith.constant 0 : index
      %c0_17 = arith.constant 0 : index
      %c0_18 = arith.constant 0 : index
      %33 = vector.load %arg7[%c0_16, %c0_17, %c0_18] : memref<1x1x128xf32, #tpu.memory_space<vmem>>, vector<1x1x128xf32>
      %34 = vector.shape_cast %23 : vector<1x128xf32> to vector<1x1x128xf32>
      %35 = arith.addf %33, %34 : vector<1x1x128xf32>
      %c0_19 = arith.constant 0 : index
      %c0_20 = arith.constant 0 : index
      %c0_21 = arith.constant 0 : index
      %36 = vector.load %arg7[%c0_19, %c0_20, %c0_21] : memref<1x1x128xf32, #tpu.memory_space<vmem>>, vector<1x1x128xf32>
      tpu.vector_store %arg7[%c0_19, %c0_20, %c0_21], %35 {strides = array<i32>} : memref<1x1x128xf32, #tpu.memory_space<vmem>>, vector<1x1x128xf32>,
      %c0_22 = arith.constant 0 : index
      %c0_23 = arith.constant 0 : index
      %c0_24 = arith.constant 0 : index
      %37 = vector.load %arg8[%c0_22, %c0_23, %c0_24] : memref<1x1x128xf32, #tpu.memory_space<vmem>>, vector<1x1x128xf32>
      %38 = vector.shape_cast %26 : vector<1x128xf32> to vector<1x1x128xf32>
      %39 = arith.addf %37, %38 : vector<1x1x128xf32>
      %c0_25 = arith.constant 0 : index
      %c0_26 = arith.constant 0 : index
      %c0_27 = arith.constant 0 : index
      %40 = vector.load %arg8[%c0_25, %c0_26, %c0_27] : memref<1x1x128xf32, #tpu.memory_space<vmem>>, vector<1x1x128xf32>
      tpu.vector_store %arg8[%c0_25, %c0_26, %c0_27], %39 {strides = array<i32>} : memref<1x1x128xf32, #tpu.memory_space<vmem>>, vector<1x1x128xf32>,
    } else {
    }
    return
  }
  func.func @transform_0(%arg0: i32, %arg1: i32, %arg2: i32) -> (i32, i32, i32) {
    %c0_i32 = arith.constant 0 : i32
    %c0_i32_0 = arith.constant 0 : i32
    return %arg0, %arg2, %c0_i32 : i32, i32, i32
  }
  func.func @transform_1(%arg0: i32, %arg1: i32, %arg2: i32) -> (i32, i32) {
    %c0_i32 = arith.constant 0 : i32
    %c0_i32_0 = arith.constant 0 : i32
    return %c0_i32, %arg1 : i32, i32
  }
  func.func @transform_2(%arg0: i32, %arg1: i32, %arg2: i32) -> (i32, i32) {
    %c0_i32 = arith.constant 0 : i32
    %c0_i32_0 = arith.constant 0 : i32
    return %c0_i32, %arg1 : i32, i32
  }
  func.func @transform_3(%arg0: i32, %arg1: i32, %arg2: i32) -> (i32, i32, i32) {
    %c0_i32 = arith.constant 0 : i32
    return %arg0, %arg2, %arg1 : i32, i32, i32
  }
  func.func @transform_4(%arg0: i32, %arg1: i32, %arg2: i32) -> (i32, i32, i32) {
    %c0_i32 = arith.constant 0 : i32
    %c0_i32_0 = arith.constant 0 : i32
    return %arg0, %c0_i32, %arg1 : i32, i32, i32
  }
  func.func @transform_5(%arg0: i32, %arg1: i32, %arg2: i32) -> (i32, i32, i32) {
    %c0_i32 = arith.constant 0 : i32
    %c0_i32_0 = arith.constant 0 : i32
    return %arg0, %c0_i32, %arg1 : i32, i32, i32
  }
}

</mosaic_0001>

<bundles_post_ra>
// kernel: tpu_custom_call.1
= control target key start
LH: loop header
LB: loop body
LE: loop exit
PB: predicated region body
PF: predicated region fallthrough
CT: control target
= control target key end

     0   :  { %s1623_s0 = inlined_call_operand.hbm [shape: bf16[2,16,128], index: 0, kind: input, shape index: {}]   ;;  %s1624_s1 = inlined_call_operand.hbm [shape: bf16[128,128], index: 1, kind: input, shape index: {}]   ;;  %s1625_s2 = inlined_call_operand.hbm [shape: f32[1,128], index: 2, kind: input, shape index: {}]   ;;  %s1626_s3 = inlined_call_operand.hbm [shape: bf16[2,16,128], index: 3, kind: output, shape index: {0}]   ;;  %s1627_s4 = inlined_call_operand.hbm [shape: f32[2,1,128], index: 4, kind: output, shape index: {1}]   ;;  %s1628_s5 = inlined_call_operand.hbm [shape: f32[2,1,128], index: 5, kind: output, shape index: {2}]  }
   0x1   :  { %1650 = sst [smem:[#allocation25_spill]] %s1623_s0 }
   0x2   :  { %1651 = sst [smem:[#allocation26_spill]] %s1624_s1 }
   0x3   :  { %1652 = sst [smem:[#allocation27_spill]] %s1625_s2 }
   0x4   :  { %1653 = sst [smem:[#allocation28_spill]] %s1626_s3 }
   0x5   :  { %1654 = sst [smem:[#allocation29_spill]] %s1627_s4 }
   0x6   :  { %1655 = sst [smem:[#allocation30_spill]] %s1628_s5 }
   0x7   :  { %11 = vsyncpa [#allocation3], 0 }
   0x8   :  { %13 = vsyncpa [#allocation3 + $0x1], 0 }
   0x9   :  { %14 = vsyncpa [#allocation6], 0 }
   0xa   :  { %15 = vsyncpa [#allocation4], 0 }
   0xb   :  { %17 = vsyncpa [#allocation4 + $0x1], 0 }
   0xc   :  { %18 = vsyncpa [#allocation10], 0 }
   0xd   :  { %20 = vsyncpa [#allocation10 + $0x1], 0  ;;  %s1223_s18 = smov 0   ;;  %s1225_s19 = smov 0  }
   0xe   :  { %s1227_s20 = smov 0   ;;  %s1229_s21 = smov 0  }
   0xf   :  { %s1231_s22 = smov 0   ;;  %s1233_s23 = smov 0  }
  0x10   :  { %s1235_s24 = smov 0   ;;  %s1237_s25 = smov 0  }
  0x11   :  { %s1239_s26 = smov 0   ;;  %s1241_s27 = smov 0  }
  0x12   :  { %s1243_s28 = smov 0  }
  0x13 LB: > { %1656 = sst [smem:[#allocation16_spill]] %s1153_s21  ;;  %s1277_s29 = sadd.s32 4294967295, %s1181_s28   ;;  %s1181_s28 = sphi %s1243_s28, %s26_s28   ;;  %s1177_s27 = sphi %s1241_s27, %s1708_s27   ;;  %s1173_s26 = sphi %s1239_s26, %s1707_s26   ;;  %s1169_s25 = sphi %s1237_s25, %s1697_s25   ;;  %s1165_s24 = sphi %s1235_s24, %s1706_s24   ;;  %s1161_s23 = sphi %s1233_s23, %s1705_s23   ;;  %s1157_s22 = sphi %s1231_s22, %s1704_s22   ;;  %s1153_s21 = sphi %s1229_s21, %s1703_s21   ;;  %s1149_s20 = sphi %s1227_s20, %s1702_s20   ;;  %s1145_s19 = sphi %s1225_s19, %s1701_s19   ;;  %s1141_s18 = sphi %s1223_s18, %s1700_s18  }
  0x14   : > { %1657 = sst [smem:[#allocation17_spill]] %s1169_s25  ;;  %s1629_s30 = sadd.s32 4294967294, %s1181_s28  }
  0x15   : > { %1658 = sst [smem:[#allocation18_spill]] %s1177_s27  ;;  %p67_p0 = scmp.ne.s32.totalorder %s1157_s22, %s1153_s21 }
  0x16   : > { %p1632_p1 = scmp.eq.s32.totalorder %s1277_s29, 0  ;;  %p1633_p2 = scmp.eq.s32.totalorder %s1277_s29, 3 }
  0x17   : > { %p153_p3 = scmp.eq.s32.totalorder %s1629_s30, 3  ;;  %p174_p5 = scmp.ne.s32.totalorder %s1149_s20, %s1145_s19 }
  0x18   : > { %p1288_p4 = por %p1632_p1, %p67_p0  ;;  %p180_p7 = scmp.ne.s32.totalorder %s1145_s19, %s1141_s18 }
  0x19   : > { %p1294_p6 = por %p153_p3, %p67_p0  ;;  %p1301_p8 = por %p174_p5, %p1633_p2 }
  0x1a   : > { %s1659_s6 = scalar_select %p1288_p4, 1, 0 }
  0x1b   : > { %s1660_s7 = scalar_select %p1294_p6, 1, 0 }
  0x1c   : > { %s1662_s8 = scalar_select %p1301_p8, 1, 0 }
  0x1d   : > { %1661 = sst [smem:[#allocation19_spill]] %s1660_s7  ;;  %p704_p9 = scmp.ge.s32.totalorder %s1181_s28, 1 }
  0x1e   : > { %1663 = sst [smem:[#allocation20_spill]] %s1662_s8  ;;  %p1306_p10 = por %p180_p7, %p153_p3 }
  0x1f   : > { %p216_p11 = scmp.lt.s32.totalorder %s1181_s28, 5  ;;  %s1183_s11 = smov [#allocation5]  }
  0x20   : > { %s1664_s9 = scalar_select %p1306_p10, 1, 0 }
  0x21   : > { %p1311_p12 = pnand %p704_p9, %p216_p11  ;;  %s230_s12 = sshll.u32 %s1183_s11, 4  ;;  %s231_s12 = int_to_ptr.vmem [resolvable:$true] %s230_s12 }
  0x22   : > { %1665 = sst [smem:[#allocation21_spill]] %s1664_s9  ;;  %s1184_s14 = smov [#allocation7]  }
  0x23   : > { %s1666_s10 = scalar_select %p1311_p12, 1, 0 }
  0x24   : > { %p780_p13 = pneg %p1311_p12  ;;  %s246_s15 = sshll.u32 %s1184_s14, 4  ;;  %s1323_s15 = int_to_ptr.vmem [resolvable:$true] %s246_s15 }
  0x25   : > { %s1668_s1 = sld [smem:[#allocation26_spill]] }
  0x26   : > { %p1319_p0 = pnand %p780_p13, %p1632_p1 }
  0x28   : > { %p911_p5 = pneg %p1319_p0 }
  0x2b   : > { %s909_s18 = scalar_lea.hbm %s1668_s1, 1024 }
  0x2c   : > { %p910_p3 = scmp.ne.s32.totalorder %s1668_s1, %s909_s18  ;;  %p916_p11 = scmp.lt.u32.totalorder %s909_s18, %s1668_s1 }
  0x2e   : > { %p912_p7 = pnand %p911_p5, %p910_p3 }
  0x30   : > { %p913_p9 = pneg %p912_p7 }
  0x32   : > { %p918_p13 = pnand %p916_p11, %p913_p9 }
  0x34   : > { %921 = shalt.err (!%p918_p13)
}
  0x35   : > { %s922_s14 = scalar_lea.vmem %s231_s12, 1024  ;;  %p930_p6 = scmp.lt.s32.totalorder %s231_s12, %s231_s12 }
  0x36   : > { %p923_p1 = scmp.ne.s32.totalorder %s231_s12, %s922_s14  ;;  %p931_p8 = scmp.lt.s32.totalorder %s922_s14, %s922_s14 }
  0x38   : > { %p925_p2 = pnand %p923_p1, %p911_p5  ;;  %p932_p4 = por %p931_p8, %p930_p6 }
  0x3a   : > { %p926_p10 = pneg %p925_p2 }
  0x3c   : > { %p933_p12 = pnand %p932_p4, %p926_p10 }
  0x3e   : > { %936 = shalt.err (!%p933_p12)
}
  0x3f   : > { %s1185_s30 = smov 64   ;;  %s1186_s16 = smov 4  }
  0x40   : > { %783 = dma.hbm_to_vmem [thread:$0]  (!%p1319_p0), %s1668_s1, 1024, %s231_s12, [#allocation6], %s1185_s30, %s1185_s30, %s1186_s16  }
  0x41   : > { %s1669_s2 = sld [smem:[#allocation27_spill]] }
  0x47   : > { %s937_s11 = scalar_lea.hbm %s1669_s2, 16 }
  0x48   : > { %p938_p1 = scmp.ne.s32.totalorder %s1669_s2, %s937_s11  ;;  %p944_p6 = scmp.lt.u32.totalorder %s937_s11, %s1669_s2 }
  0x4a   : > { %p940_p2 = pnand %p938_p1, %p911_p5 }
  0x4c   : > { %p941_p4 = pneg %p940_p2 }
  0x4e   : > { %p946_p8 = pnand %p944_p6, %p941_p4 }
  0x50   : > { %949 = shalt.err (!%p946_p8)
}
  0x51   : > { %s950_s12 = scalar_lea.vmem %s1323_s15, 16  ;;  %s957_s5 = scalar_lea.vmem %s1323_s15, 32 }
  0x52   : > { %p951_p10 = scmp.ne.s32.totalorder %s1323_s15, %s950_s12  ;;  %p958_p7 = scmp.lt.s32.totalorder %s1323_s15, %s1323_s15 }
  0x53   : > { %p959_p9 = scmp.lt.s32.totalorder %s957_s5, %s950_s12 }
  0x54   : > { %p953_p12 = pnand %p951_p10, %p911_p5 }
  0x55   : > { %p960_p11 = por %p959_p9, %p958_p7 }
  0x56   : > { %p954_p3 = pneg %p953_p12 }
  0x58   : > { %p961_p13 = pnand %p960_p11, %p954_p3 }
  0x5a   : > { %964 = shalt.err (!%p961_p13)
}
  0x5b   : > { %786 = dma.hbm_to_vmem [thread:$0]  (!%p1319_p0), %s1669_s2, 16, %s1323_s15, [#allocation6]  }
  0x5c   : > { %s38_s30 = sadd.s32 1, %s1173_s26  ;;  %s45_s13 = sadd.s32 1, %s1177_s27 }
  0x5d   : > { %p39_p5 = scmp.ge.s32.totalorder %s38_s30, 2  ;;  %p61_p1 = scmp.ne.s32.totalorder %s1161_s23, %s1157_s22 }
  0x5e   : > { %p62_p2 = scmp.eq.s32.totalorder %s1181_s28, 0  ;;  %s54_s7 = sadd.s32 1, %s1161_s23 }
  0x5f   : > { %s1710_s30 = smov (%p39_p5, %s38_s30), 0  ;;  %s1712_s13 = smov (!%p39_p5, %s45_s13), %s1177_s27 }
  0x60   : > { %1670 = sst [smem:[#allocation22_spill]] %s1710_s30  ;;  %s50_s16 = ssub.s32 %s1173_s26, %s1710_s30 }
  0x61   : > { %p47_p4 = scmp.ge.s32.totalorder %s1712_s13, 2  ;;  %p1671_p6 = scmp.eq.s32.totalorder %s1277_s29, 3 }
  0x62   : > { %p1390_p8 = por %p62_p2, %p61_p1  ;;  %s164_s17 = sadd.s32 1, %s1149_s20 }
  0x63   : > { %p1386_p0 = por %p1671_p6, %p61_p1  ;;  %s1714_s13 = smov (%p47_p4, %s1712_s13), 0 }
  0x64   : > { %1675 = sst [smem:[#allocation24_spill]] %s1714_s13  ;;  %p803_p10 = scmp.lt.s32.totalorder %s1181_s28, 4 }
  0x65   : > { %s1672_s15 = scalar_select %p1386_p0, 1, 0 }
  0x66   : > { %s257_s18 = sand.u32 1, %s1161_s23   ;;  %s49_s11 = ssub.s32 %s1177_s27, %s1714_s13 }
  0x67   : > { %1673 = sst [smem:[#allocation23_spill]] %s1672_s15  ;;  %s709_s14 = sshll.u32 %s1177_s27, 1 }
  0x68   : > { %s51_s12 = sor.u32 %s50_s16, %s49_s11  ;;  %p162_p12 = scmp.eq.s32.totalorder %s49_s11, 0 }
  0x69   : > { %p52_p3 = scmp.eq.s32.totalorder %s51_s12, 0  ;;  %s708_s5 = sshll.u32 %s257_s18, 2 }
  0x6a   : > { %s1403_s3 = scalar_select %p162_p12, %s1149_s20, %s164_s17  }
  0x6b   : > { %s1406_s21 = scalar_select %p52_p3, %s1161_s23, %s54_s7  }
  0x6c   : > { %s266_s1 = sadd.s32 %s1173_s26, %s709_s14  ;;  %s261_s30 = scalar_lea.vmem [#allocation2], %s708_s5 }
  0x6d   : > { %s710_s2 = sshll.u32 %s266_s1, 6  ;;  %s270_s15 = sshll.u32 %s261_s30, 4  ;;  %s1414_s15 = int_to_ptr.vmem [resolvable:$true] %s270_s15 }
  0x6e   : > { %s1676_s0 = sld [smem:[#allocation25_spill]]  ;;  %p1420_p7 = pnand %p803_p10, %p1390_p8 }
  0x6f   : > { %s258_s1 = scalar_lea.sflag [#allocation3], %s257_s18 }
  0x70   : > { %p967_p11 = pneg %p1420_p7 }
  0x74   : > { %s1412_s25 = scalar_lea.hbm %s1676_s0, %s710_s2  ;;  %s970_s8 = scalar_lea.hbm %s1676_s0, 256 }
  0x75   : > { %s965_s30 = scalar_lea.hbm %s1412_s25, 64  ;;  %p971_p1 = scmp.lt.u32.totalorder %s1412_s25, %s1676_s0 }
  0x76   : > { %p966_p9 = scmp.ne.s32.totalorder %s1412_s25, %s965_s30  ;;  %p972_p2 = scmp.lt.u32.totalorder %s970_s8, %s965_s30 }
  0x77   : > { %p974_p6 = scmp.lt.u32.totalorder %s965_s30, %s1412_s25 }
  0x78   : > { %p968_p13 = pnand %p967_p11, %p966_p9  ;;  %p973_p4 = por %p972_p2, %p971_p1 }
  0x7a   : > { %p969_p5 = pneg %p968_p13  ;;  %p975_p8 = por %p974_p6, %p973_p4 }
  0x7c   : > { %p976_p10 = pnand %p975_p8, %p969_p5 }
  0x7e   : > { %979 = shalt.err (!%p976_p10)
}
  0x7f   : > { %s980_s17 = scalar_lea.vmem %s1414_s15, 64  ;;  %s1187_s18 = smov [#allocation2]  }
  0x80   : > { %p981_p12 = scmp.ne.s32.totalorder %s1414_s15, %s980_s17  ;;  %s985_s11 = sshll.u32 %s1187_s18, 4  ;;  %s986_s11 = int_to_ptr.vmem [resolvable:$false] %s985_s11 }
  0x81   : > { %s987_s14 = scalar_lea.vmem %s986_s11, 128  ;;  %p988_p13 = scmp.lt.s32.totalorder %s1414_s15, %s986_s11 }
  0x82   : > { %p983_p3 = pnand %p981_p12, %p967_p11  ;;  %p989_p1 = scmp.lt.s32.totalorder %s987_s14, %s980_s17 }
  0x84   : > { %p984_p9 = pneg %p983_p3  ;;  %p990_p2 = por %p989_p1, %p988_p13 }
  0x86   : > { %p991_p4 = pnand %p990_p2, %p984_p9 }
  0x88   : > { %994 = shalt.err (!%p991_p4)
}
  0x89   : > { %790 = dma.hbm_to_vmem [thread:$0]  (!%p1420_p7), %s1412_s25, 64, %s1414_s15, %s258_s1  }
  0x8a   : > { %p1678_p5 = scmp.ne.s32.totalorder %s1666_s10, 0 }
  0x8b   : > { %s1452_s12 = sand.u32 (!%p1678_p5), 1, %s1157_s22   ;;  %p1679_p11 = scmp.ne.s32.totalorder (!%p1678_p5), %s1659_s6, 0 }
  0x8c   : > { %279 = sbr.rel (%p1678_p5) target bundleno = 505 (0x1f9), region = 32  ;;  %s712_s5 = sshll.u32 (!%p1678_p5), %s1452_s12, 2 }
  0x8d   : > { %s282_s30 = scalar_lea.sflag (!%p1678_p5), [#allocation3], %s1452_s12  ;;  %s1458_s2 = scalar_lea.vmem (!%p1678_p5), [#allocation2], %s712_s5 }
  0x93   : > { %1124 = dma.done.wait (%p1679_p11), %s282_s30, 64  }
  0x94   : > { %1126 = vsyncadd (%p1679_p11), %s282_s30, 4294967232  ;;  %p1680_p7 = scmp.eq.s32.totalorder %s1277_s29, 0 }
  0x96   : > { %1128 = dma.done.wait (%p1680_p7), [#allocation6], 1040   ;;  %p1681_p6 = pmov %p1680_p7 }
  0x97   : > { %s320_s25 = sand.u32 1, %s1145_s19   ;;  %v1188_v0 = vmov 0.0   ;;  %vm1189_vm0 = vmmov 0   ;;  %v901_v1 = vld [vmem:[#allocation5] sm:$0xff]   ;;  %v902_v2 = vld [vmem:[#allocation5 + $0x8] sm:$0xff]   ;;  %v903_v3 = vld [vmem:[#allocation5 + $0x10] sm:$0xff]   ;;  %v444_v10 = vlaneseq }
  0x98   : > { %1130 = vsyncadd (%p1681_p6), [#allocation6], 4294966256  ;;  %744 = vmatprep.subr.bf16.mxu0 %v1188_v0  ;;  %760 = vmatprep.mubr.msk.bf16.mxu0 %vm1189_vm0, %v1188_v0  ;;  %v904_v4 = vld [vmem:[#allocation5 + $0x18] sm:$0xff]   ;;  %v905_v5 = vld [vmem:[#allocation5 + $0x20] sm:$0xff]   ;;  %s725_s6 = sshll.u32 %s1165_s24, 3  ;;  %s1473_s10 = scalar_lea.vmem [#allocation8], %s712_s5 }
  0x99   : > { %745 = vmatpush3.bf16.msra.mxu0 %v901_v1  ;;  %v906_v6 = vld [vmem:[#allocation5 + $0x28] sm:$0xff]   ;;  %v907_v7 = vld [vmem:[#allocation5 + $0x30] sm:$0xff]   ;;  %v908_v8 = vld [vmem:[#allocation5 + $0x38] sm:$0xff]   ;;  %v445_v11 = vshrl.u32 %v444_v10, 7  ;;  %v447_v12 = vstv %s725_s6  ;;  %s321_s15 = scalar_lea.vmem [#allocation9], %s320_s25  ;;  %s1480_s16 = scalar_lea.vmem [#allocation11], %s320_s25 }
  0x9a   : > { %746 = vmatprep.subr.bf16.mxu0 %v1188_v0  ;;  %v329_v9 = vld [vmem:[%s1458_s2] sm:$0xf]  ;;  %v716_v13 = vld [vmem:[#allocation7] ss:$0 sm:$0xff]  ;;  %p726_p8 = scmp.ne.s32.totalorder %s1165_s24, 0 }
  0x9b   : > { %v448_v14 = vadd.s32 %v447_v12, %v445_v11 }
  0x9d   : > { %747 = vmatpush3.bf16.msra.mxu0 %v902_v2  ;;  %vm449_vm1 = vcmp.lt.s32.totalorder %v448_v14, 14 }
  0x9e   : > { %748 = vmatprep.subr.bf16.mxu0 %v1188_v0 }
  0xa1   : > { %749 = vmatpush3.bf16.msra.mxu0 %v903_v3 }
  0xa2   : > { %750 = vmatprep.subr.bf16.mxu0 %v1188_v0 }
  0xa5   : > { %751 = vmatpush3.bf16.msra.mxu0 %v904_v4 }
  0xa6   : > { %752 = vmatprep.subr.bf16.mxu0 %v1188_v0 }
  0xa9   : > { %753 = vmatpush3.bf16.msra.mxu0 %v905_v5 }
  0xaa   : > { %754 = vmatprep.subr.bf16.mxu0 %v1188_v0 }
  0xad   : > { %755 = vmatpush3.bf16.msra.mxu0 %v906_v6 }
  0xae   : > { %756 = vmatprep.subr.bf16.mxu0 %v1188_v0 }
  0xb1   : > { %757 = vmatpush3.bf16.msra.mxu0 %v907_v7 }
  0xb2   : > { %758 = vmatprep.subr.bf16.mxu0 %v1188_v0 }
  0xb5   : > { %759 = vmatpush3.bf16.msra.mxu0 %v908_v8 }
  0xb8   : > { %761 = vmatmul.mubr.bf16.vlgmr.msra.gmra.mrb[0].mxu0 %v329_v9 }
 0x18b   : > { %v435_v15 = vpop.f32.mrb[0].mxu0 }
 0x18c   : > { %v436_v16 = vadd.f32 %v716_v13, %v435_v15  ;;  %v762_v17 = vpop.f32.mrb[1].mxu0 }
 0x18d   : > { %v438_v18 = vpop.f32.mrb[2].mxu0 }
 0x18e   : > { %v441_v19 = vmax.f32 %v436_v16, 0.0  ;;  %v763_v20 = vpop.f32.mrb[3].mxu0 }
 0x190   : > { %v442_v21 = vpack.c.bf16 %v441_v19, %v441_v19  ;;  %v452_v22 = vsel %vm449_vm1, %v441_v19, 0.0 }
 0x191   : > { %v453_v23 = vrot.slane %v452_v22, 4  ;;  %v459_v24 = vmul.f32 %v452_v22, %v452_v22 }
 0x192   : > { %443 = vst [vmem:[%s1473_s10] sm:$0xf] %v442_v21 }
 0x193   : > { %v454_v25 = vadd.f32 %v453_v23, %v452_v22  ;;  %v460_v26 = vrot.slane %v459_v24, 4 }
 0x195   : > { %v455_v27 = vrot.slane %v454_v25, 2  ;;  %v461_v28 = vadd.f32 %v460_v26, %v459_v24 }
 0x197   : > { %v456_v29 = vadd.f32 %v455_v27, %v454_v25  ;;  %v462_v30 = vrot.slane %v461_v28, 2  ;;  %469 = sbr.rel (%p726_p8) target bundleno = 416 (0x1a0), region = 48 }
 0x199   : > { %v457_v31 = vrot.slane %v456_v29, 1  ;;  %v463_v32 = vadd.f32 %v462_v30, %v461_v28 }
 0x19b   : > { %v458_v33 = vadd.f32 %v457_v31, %v456_v29  ;;  %v464_v34 = vrot.slane %v463_v32, 1 }
 0x19d   : > { %v465_v35 = vadd.f32 %v464_v34, %v463_v32  ;;  %470 = vst [vmem:[%s321_s15] sm:$0x1] (!%p726_p8), %v458_v33 }
 0x19f   : > { %471 = vst [vmem:[%s1480_s16] sm:$0x1] %v465_v35 }
 0x1a0 PF: > { %p727_p10 = scmp.eq.s32.totalorder %s1165_s24, 0 }
 0x1a2   : > { %475 = sbr.rel (%p727_p10) target bundleno = 427 (0x1ab), region = 52 }
 0x1a6   : > { %v476_v36 = vld [vmem:[%s321_s15] sm:$0x1] (!%p727_p10) }
 0x1a7   : > { %v479_v37 = vld [vmem:[%s1480_s16] sm:$0x1] (!%p727_p10)  ;;  %v477_v38 = vadd.f32 (!%p727_p10), %v476_v36, %v458_v33 }
 0x1a8   : > { %v480_v39 = vadd.f32 (!%p727_p10), %v479_v37, %v465_v35 }
 0x1a9   : > { %478 = vst [vmem:[%s321_s15] sm:$0x1] %v477_v38 }
 0x1aa   : > { %481 = vst [vmem:[%s1480_s16] sm:$0x1] %v480_v39 }
 0x1ab PF: > { %s1682_s1 = sld [smem:[#allocation17_spill]]  ;;  %s1683_s4 = sld [smem:[#allocation20_spill]] }
 0x1ac   : > { %s487_s8 = sand.u32 1, %s1277_s29   ;;  %s1684_s18 = sld [smem:[#allocation29_spill]] }
 0x1ad   : > { %s521_s5 = sshll.u32 %s321_s15, 4  ;;  %s1499_s2 = scalar_lea.sflag [#allocation10], %s487_s8  ;;  %s1496_s5 = int_to_ptr.vmem [resolvable:$true] %s521_s5 }
 0x1ae   : > { %s995_s25 = scalar_lea.vmem %s1496_s5, 16  ;;  %s1190_s29 = smov [#allocation9]  }
 0x1af   : > { %p996_p12 = scmp.ne.s32.totalorder %s1496_s5, %s995_s25  ;;  %s999_s6 = sshll.u32 %s1190_s29, 4  ;;  %s1000_s6 = int_to_ptr.vmem [resolvable:$false] %s999_s6 }
 0x1b0   : > { %s1001_s9 = scalar_lea.vmem %s1000_s6, 32  ;;  %p1002_p1 = scmp.lt.s32.totalorder %s1496_s5, %s1000_s6 }
 0x1b1   : > { %s731_s7 = sshll.u32 %s1682_s1, 4  ;;  %s729_s30 = sshll.u32 %s1682_s1, 1 }
 0x1b2   : > { %s1685_s11 = smov %s1684_s18  ;;  %s1494_s14 = scalar_lea.hbm %s1684_s18, %s731_s7 }
 0x1b3   : > { %p1686_p3 = scmp.ne.s32.totalorder %s1683_s4, 0  ;;  %p1003_p2 = scmp.lt.s32.totalorder %s1001_s9, %s995_s25 }
 0x1b5   : > { %p997_p9 = pnand %p996_p12, %p1686_p3  ;;  %p1004_p4 = por %p1003_p2, %p1002_p1 }
 0x1b7   : > { %p998_p13 = pneg %p997_p9 }
 0x1b9   : > { %p1005_p5 = pnand %p1004_p4, %p998_p13 }
 0x1bb   : > { %1008 = shalt.err (!%p1005_p5)
}
 0x1bc   : > { %s1009_s15 = scalar_lea.hbm %s1494_s14, 16  ;;  %s1013_s18 = scalar_lea.hbm %s1685_s11, 32 }
 0x1bd   : > { %p1010_p11 = scmp.ne.s32.totalorder %s1494_s14, %s1009_s15  ;;  %p1014_p8 = scmp.lt.u32.totalorder %s1494_s14, %s1685_s11 }
 0x1be   : > { %p1015_p10 = scmp.lt.u32.totalorder %s1013_s18, %s1009_s15  ;;  %p1017_p9 = scmp.lt.u32.totalorder %s1009_s15, %s1494_s14 }
 0x1bf   : > { %p1011_p7 = pnand %p1010_p11, %p1686_p3 }
 0x1c0   : > { %p1016_p12 = por %p1015_p10, %p1014_p8 }
 0x1c1   : > { %p1012_p6 = pneg %p1011_p7 }
 0x1c2   : > { %p1018_p13 = por %p1017_p9, %p1016_p12 }
 0x1c4   : > { %p1019_p1 = pnand %p1018_p13, %p1012_p6 }
 0x1c6   : > { %1022 = shalt.err (!%p1019_p1)
}
 0x1c7   : > { %775 = dma.vmem_to_hbm [thread:$0]  (%p1686_p3), %s1496_s5, 16, %s1494_s14, %s1499_s2  }
 0x1c8   : > { %s503_s9 = sadd.s32 %s1165_s24, %s729_s30  ;;  %s507_s8 = sshll.u32 %s1473_s10, 4  ;;  %s1527_s8 = int_to_ptr.vmem [resolvable:$true] %s507_s8 }
 0x1c9   : > { %s730_s17 = sshll.u32 %s503_s9, 6  ;;  %s1688_s29 = sld [smem:[#allocation28_spill]] }
 0x1ca   : > { %s1689_s13 = sld [smem:[#allocation30_spill]]  ;;  %s483_s14 = scalar_lea.sflag [#allocation4], %s1452_s12 }
 0x1cb   : > { %s1023_s24 = scalar_lea.vmem %s1527_s8, 64  ;;  %s1191_s10 = smov [#allocation8]  }
 0x1cc   : > { %p1024_p2 = scmp.ne.s32.totalorder %s1527_s8, %s1023_s24  ;;  %s1027_s5 = sshll.u32 %s1191_s10, 4  ;;  %s1028_s5 = int_to_ptr.vmem [resolvable:$false] %s1027_s5 }
 0x1cd   : > { %s1029_s30 = scalar_lea.vmem %s1028_s5, 128  ;;  %p1030_p11 = scmp.lt.s32.totalorder %s1527_s8, %s1028_s5 }
 0x1ce   : > { %p1025_p4 = pnand %p1024_p2, %p1386_p0  ;;  %p1031_p7 = scmp.lt.s32.totalorder %s1029_s30, %s1023_s24 }
 0x1cf   : > { %s1532_s6 = scalar_lea.hbm %s1688_s29, %s730_s17 }
 0x1d0   : > { %s1539_s27 = scalar_lea.hbm %s1689_s13, %s731_s7  ;;  %p1026_p5 = pneg %p1025_p4 }
 0x1d1   : > { %p1032_p6 = por %p1031_p7, %p1030_p11 }
 0x1d3   : > { %p1033_p8 = pnand %p1032_p6, %p1026_p5 }
 0x1d5   : > { %1036 = shalt.err (!%p1033_p8)
}
 0x1d6   : > { %s1037_s0 = scalar_lea.hbm %s1532_s6, 64  ;;  %s1041_s7 = scalar_lea.hbm %s1688_s29, 256 }
 0x1d7   : > { %p1038_p10 = scmp.ne.s32.totalorder %s1532_s6, %s1037_s0  ;;  %p1042_p13 = scmp.lt.u32.totalorder %s1532_s6, %s1688_s29 }
 0x1d8   : > { %p1043_p1 = scmp.lt.u32.totalorder %s1041_s7, %s1037_s0  ;;  %p1045_p4 = scmp.lt.u32.totalorder %s1037_s0, %s1532_s6 }
 0x1d9   : > { %p1039_p12 = pnand %p1038_p10, %p1386_p0 }
 0x1da   : > { %p1044_p2 = por %p1043_p1, %p1042_p13 }
 0x1db   : > { %p1040_p9 = pneg %p1039_p12 }
 0x1dc   : > { %p1046_p5 = por %p1045_p4, %p1044_p2 }
 0x1de   : > { %p1047_p11 = pnand %p1046_p5, %p1040_p9 }
 0x1e0   : > { %1050 = shalt.err (!%p1047_p11)
}
 0x1e1   : > { %774 = dma.vmem_to_hbm [thread:$0]  (%p1386_p0), %s1527_s8, 64, %s1532_s6, %s483_s14  }
 0x1e2   : > { %s535_s17 = sshll.u32 %s1480_s16, 4  ;;  %s1192_s18 = smov [#allocation11]   ;;  %s536_s17 = int_to_ptr.vmem [resolvable:$true] %s535_s17 }
 0x1e3   : > { %s1051_s15 = scalar_lea.vmem %s536_s17, 16  ;;  %s1055_s24 = sshll.u32 %s1192_s18, 4  ;;  %s1056_s24 = int_to_ptr.vmem [resolvable:$false] %s1055_s24 }
 0x1e4   : > { %p1052_p7 = scmp.ne.s32.totalorder %s536_s17, %s1051_s15  ;;  %s1057_s10 = scalar_lea.vmem %s1056_s24, 32 }
 0x1e5   : > { %p1058_p10 = scmp.lt.s32.totalorder %s536_s17, %s1056_s24  ;;  %p1059_p12 = scmp.lt.s32.totalorder %s1057_s10, %s1051_s15 }
 0x1e6   : > { %p1053_p6 = pnand %p1052_p7, %p1686_p3 }
 0x1e7   : > { %p1060_p9 = por %p1059_p12, %p1058_p10 }
 0x1e8   : > { %p1054_p8 = pneg %p1053_p6 }
 0x1ea   : > { %p1061_p13 = pnand %p1060_p9, %p1054_p8 }
 0x1ec   : > { %1064 = shalt.err (!%p1061_p13)
}
 0x1ed   : > { %s1065_s16 = scalar_lea.hbm %s1539_s27, 16  ;;  %s1069_s6 = scalar_lea.hbm %s1689_s13, 32 }
 0x1ee   : > { %p1066_p0 = scmp.ne.s32.totalorder %s1539_s27, %s1065_s16  ;;  %p1070_p4 = scmp.lt.u32.totalorder %s1539_s27, %s1689_s13 }
 0x1ef   : > { %p1071_p5 = scmp.lt.u32.totalorder %s1069_s6, %s1065_s16  ;;  %p1073_p7 = scmp.lt.u32.totalorder %s1065_s16, %s1539_s27 }
 0x1f0   : > { %p1067_p1 = pnand %p1066_p0, %p1686_p3 }
 0x1f1   : > { %p1072_p11 = por %p1071_p5, %p1070_p4 }
 0x1f2   : > { %p1068_p2 = pneg %p1067_p1 }
 0x1f3   : > { %p1074_p6 = por %p1073_p7, %p1072_p11 }
 0x1f5   : > { %p1075_p8 = pnand %p1074_p6, %p1068_p2 }
 0x1f7   : > { %1078 = shalt.err (!%p1075_p8)
}
 0x1f8   : > { %776 = dma.vmem_to_hbm [thread:$0]  (%p1686_p3), %s536_s17, 16, %s1539_s27, %s1499_s2  }
 0x1f9 PF: > { %s1690_s30 = sld [smem:[#allocation16_spill]]  ;;  %s1691_s0 = sld [smem:[#allocation19_spill]] }
 0x1fa   : > { %p806_p10 = scmp.ge.s32.totalorder %s1181_s28, 2 }
 0x1ff   : > { %s547_s12 = sand.u32 1, %s1690_s30   ;;  %p1692_p12 = scmp.ne.s32.totalorder %s1691_s0, 0 }
 0x200   : > { %s548_s1 = scalar_lea.sflag [#allocation4], %s547_s12 }
 0x201   : > { %p792_p9 = pnand %p806_p10, %p1692_p12 }
 0x203   : > { %1132 = dma.done.wait (!%p792_p9), %s548_s1, 64  }
 0x204   : > { %1134 = vsyncadd (!%p792_p9), %s548_s1, 4294967232  ;;  %s1693_s7 = sadd.s32 4294967294, %s1181_s28   ;;  %s1694_s11 = sld [smem:[#allocation21_spill]] }
 0x205   : > { %s556_s9 = sand.u32 1, %s1693_s7  }
 0x206   : > { %s557_s4 = scalar_lea.sflag [#allocation10], %s556_s9 }
 0x20a   : > { %p1695_p13 = scmp.ne.s32.totalorder %s1694_s11, 0 }
 0x20c   : > { %p795_p0 = pnand %p806_p10, %p1695_p13 }
 0x20e   : > { %1136 = dma.done.wait (!%p795_p0), %s557_s4, 32  }
 0x20f   : > { %1138 = vsyncadd (!%p795_p0), %s557_s4, 4294967264  ;;  %s26_s28 = sadd.s32 1, %s1181_s28   ;;  %s1696_s27 = smov %s1406_s21 }
 0x210   : > { %p23_p3 = scmp.ge.s32.totalorder %s26_s28, 6   ;;  %s1697_s25 = sld [smem:[#allocation18_spill]] }
 0x211   : > { %s1698_s2 = sld [smem:[#allocation22_spill]]  ;;  %s1699_s17 = sld [smem:[#allocation24_spill]] }
 0x212   : > { %s1700_s18 = smov %s1145_s19  ;;  %s1701_s19 = smov %s1149_s20 }
 0x213   : > { %s1702_s20 = smov %s1403_s3  ;;  %s1703_s21 = smov %s1157_s22 }
 0x214   : > { %s1704_s22 = smov %s1161_s23  ;;  %s1705_s23 = smov %s1696_s27 }
 0x215   : > { %s1706_s24 = smov %s1173_s26  ;;  %25 = sbr.rel (!%p23_p3) target bundleno = 19 (0x13), region = 127 }
 0x217   : > { %s1707_s26 = smov %s1698_s2  ;;  %s1708_s27 = smov %s1699_s17 }
 0x21c   :  { %569 = vsyncpa [#allocation3], 1 }
 0x21d   :  { %571 = vsyncpa [#allocation3 + $0x1], 1 }
 0x21e   :  { %572 = vsyncpa [#allocation6], 1 }
 0x21f   :  { %573 = vsyncpa [#allocation4], 1 }
 0x220   :  { %575 = vsyncpa [#allocation4 + $0x1], 1 }
 0x221   :  { %576 = vsyncpa [#allocation10], 1 }
 0x222   :  { %578 = vsyncpa [#allocation10 + $0x1], 1 }

</bundles_post_ra>
